<compile_context>
chip_gen: v5e
topology: v5e:2x2
jax: 0.10.0
libtpu: 0.0.40
codegen_flags: <defaults>
</compile_context>

<pallas_src>
import jax
import jax.numpy as jnp
import numpy as np
from jax.experimental import pallas as pl
from jax.experimental.pallas import tpu as pltpu

KH, KW = 3, 3
BN_EPS = 1e-5


def conv_stats_kernel(x_ref, w_ref, o_ref, s0_ref, s1_ref):
    """3x3 / stride 1 / pad 1 conv on one batch element + partial BN stats.

    x_ref : (1, H, W*Cin)        lane index = x*Cin + ci
    w_ref : (KH, W*Cin, W*Cout)  banded weights (one per kernel row dy)
    o_ref : (1, H, W*Cout)       lane index = x*Cout + co
    s0_ref: (1, 1, W*Cout)       per-lane sum over H        (partial BN stats)
    s1_ref: (1, 1, W*Cout)       per-lane sum of squares over H
    """
    x = x_ref[0]          # (H, W*Cin)
    H = x.shape[0]

    # One MXU matmul per kernel row: K = W*Cin, N = W*Cout (lane dense).
    p0 = jnp.dot(x, w_ref[0], preferred_element_type=jnp.float32)  # dy = 0
    p1 = jnp.dot(x, w_ref[1], preferred_element_type=jnp.float32)  # dy = 1
    p2 = jnp.dot(x, w_ref[2], preferred_element_type=jnp.float32)  # dy = 2

    # Output row y needs p0 from input row y-1 and p2 from input row y+1
    # (rows outside [0, H) are the zero padding).  Express the shifts as two
    # tiny (H, H) shift-matrix matmuls: no slicing / relayout copies.
    r = jax.lax.broadcasted_iota(jnp.int32, (H, H), 0)
    c = jax.lax.broadcasted_iota(jnp.int32, (H, H), 1)
    down = (r == c + 1).astype(jnp.float32)   # down[y, y-1] = 1
    up = (c == r + 1).astype(jnp.float32)     # up[y, y+1]   = 1

    acc = (p1
           + jnp.dot(down, p0, preferred_element_type=jnp.float32)
           + jnp.dot(up, p2, preferred_element_type=jnp.float32))

    o_ref[0] = acc.astype(o_ref.dtype)
    s0_ref[0] = jnp.sum(acc, axis=0, keepdims=True)
    s1_ref[0] = jnp.sum(acc * acc, axis=0, keepdims=True)


def bn_relu_kernel(x_ref, scale_ref, shift_ref, o_ref):
    """y = relu(x * scale + shift) on a lane-dense (H, W*Cout) tile."""
    x = x_ref[0].astype(jnp.float32)
    y = x * scale_ref[...] + shift_ref[...]
    o_ref[0] = jnp.maximum(y, 0.0).astype(o_ref.dtype)


def _banded_weights(weight_oihw, W):
    """OIHW conv weights -> (KH, W*Cin, W*Cout) banded matrices.

    band[dy, xi*Cin + ci, xo*Cout + co] = w[dy, dx, ci, co] with
    xi = xo + dx - 1; entries with xi outside [0, W) are dropped, which is
    exactly the zero padding along W.
    """
    w = jnp.transpose(weight_oihw, (2, 3, 1, 0))        # (KH, KW, Cin, Cout)
    Cin, Cout = w.shape[2], w.shape[3]
    band = jnp.zeros((KH, W, Cin, W, Cout), w.dtype)
    for dx in range(KW):
        mask = jnp.eye(W, W, k=1 - dx, dtype=w.dtype)   # mask[xi, xo]
        band = band + mask[None, :, None, :, None] * w[:, dx][:, None, :, None, :]
    return band.reshape(KH, W * Cin, W * Cout)


@jax.jit
def conv_block_forward(x_nchw, weight_oihw, bias, gamma, beta):
    N, Cin, H, W = x_nchw.shape
    Cout = weight_oihw.shape[0]
    # `bias` is intentionally unused: a per-channel additive bias is exactly
    # cancelled by the mean subtraction of training-mode BatchNorm.
    del bias

    # NCHW -> lane-dense (N, H, W*Cin).  No spatial pre-padding in HBM.
    x = jnp.transpose(x_nchw, (0, 2, 3, 1)).reshape(N, H, W * Cin)
    w_band = _banded_weights(weight_oihw, W)

    conv_out, ssum, ssq = pl.pallas_call(
        conv_stats_kernel,
        out_shape=(
            jax.ShapeDtypeStruct((N, H, W * Cout), jnp.float32),
            jax.ShapeDtypeStruct((N, 1, W * Cout), jnp.float32),
            jax.ShapeDtypeStruct((N, 1, W * Cout), jnp.float32),
        ),
        grid=(N,),
        in_specs=[
            pl.BlockSpec((1, H, W * Cin), lambda n: (n, 0, 0)),
            pl.BlockSpec((KH, W * Cin, W * Cout), lambda n: (0, 0, 0)),
        ],
        out_specs=(
            pl.BlockSpec((1, H, W * Cout), lambda n: (n, 0, 0)),
            pl.BlockSpec((1, 1, W * Cout), lambda n: (n, 0, 0)),
            pl.BlockSpec((1, 1, W * Cout), lambda n: (n, 0, 0)),
        ),
        compiler_params=pltpu.CompilerParams(
            dimension_semantics=("parallel",)),
    )(x, w_band)

    # Tiny per-channel reduction (2 * Cout numbers) + BN affine precompute.
    total_sum = jnp.sum(ssum.reshape(N, W, Cout), axis=(0, 1))   # (Cout,)
    total_sq = jnp.sum(ssq.reshape(N, W, Cout), axis=(0, 1))     # (Cout,)
    cnt = jnp.float32(N * H * W)
    mean = total_sum / cnt
    var = jnp.maximum(total_sq / cnt - mean * mean, 0.0)  # biased (training BN)
    inv = jax.lax.rsqrt(var + BN_EPS)
    scale = gamma * inv
    shift = beta - mean * scale
    scale_t = jnp.tile(scale, W)[None, :]                 # (1, W*Cout) lane-dense
    shift_t = jnp.tile(shift, W)[None, :]

    y = pl.pallas_call(
        bn_relu_kernel,
        out_shape=jax.ShapeDtypeStruct((N, H, W * Cout), x_nchw.dtype),
        grid=(N,),
        in_specs=[
            pl.BlockSpec((1, H, W * Cout), lambda n: (n, 0, 0)),
            pl.BlockSpec((1, W * Cout), lambda n: (0, 0)),
            pl.BlockSpec((1, W * Cout), lambda n: (0, 0)),
        ],
        out_specs=pl.BlockSpec((1, H, W * Cout), lambda n: (n, 0, 0)),
        compiler_params=pltpu.CompilerParams(
            dimension_semantics=("parallel",)),
    )(conv_out, scale_t, shift_t)

    # Lane-dense slab -> NCHW (layout plumbing only).
    return jnp.transpose(y.reshape(N, H, W, Cout), (0, 3, 1, 2))


def reference_forward(x_nchw, weight_oihw, bias, gamma, beta):
    """Pure-JAX reference (includes the conv bias; it must cancel in BN)."""
    out = jax.lax.conv_general_dilated(
        x_nchw, weight_oihw, window_strides=(1, 1), padding=((1, 1), (1, 1)),
        dimension_numbers=("NCHW", "OIHW", "NCHW"))
    out = out + bias[None, :, None, None]
    mean = jnp.mean(out, axis=(0, 2, 3), keepdims=True)
    var = jnp.mean((out - mean) ** 2, axis=(0, 2, 3), keepdims=True)
    out = (out - mean) * jax.lax.rsqrt(var + BN_EPS)
    out = out * gamma[None, :, None, None] + beta[None, :, None, None]
    return jnp.maximum(out, 0.0)


if __name__ == "__main__":
    # Small deterministic problem: in_features=4, out_features=8, 16x16 images.
    N, Cin, Cout, H, W = 2, 4, 8, 16, 16

    key = jax.random.PRNGKey(0)
    kx, kw, kb = jax.random.split(key, 3)
    x = jax.random.normal(kx, (N, Cin, H, W), dtype=jnp.float32)

    fan_in = Cin * KH * KW
    wbound = 1.0 / np.sqrt(fan_in)
    weight = jax.random.uniform(kw, (Cout, Cin, KH, KW), jnp.float32,
                                minval=-wbound, maxval=wbound)
    bias = jax.random.uniform(kb, (Cout,), jnp.float32,
                              minval=-wbound, maxval=wbound)
    gamma = jnp.ones((Cout,), jnp.float32)   # BatchNorm2d default weight
    beta = jnp.zeros((Cout,), jnp.float32)   # BatchNorm2d default bias

    out = jax.block_until_ready(conv_block_forward(x, weight, bias, gamma, beta))
    ref = jax.block_until_ready(reference_forward(x, weight, bias, gamma, beta))

    assert out.shape == (N, Cout, H, W)
    np.testing.assert_allclose(np.asarray(out), np.asarray(ref),
                               atol=1e-4, rtol=1e-4)
    print("KERNEL_OK")
</pallas_src>

<mosaic_0001>
module attributes {stable_mosaic.version = 11 : i64} {
  func.func @conv_stats_kernel(%arg0: i32, %arg1: memref<1x16x64xf32, #tpu.memory_space<vmem>>, %arg2: memref<3x64x128xf32, #tpu.memory_space<vmem>>, %arg3: memref<1x16x128xf32, #tpu.memory_space<vmem>>, %arg4: memref<1x1x128xf32, #tpu.memory_space<vmem>>, %arg5: memref<1x1x128xf32, #tpu.memory_space<vmem>>) attributes {dimension_semantics = [#tpu.dimension_semantics<parallel>], iteration_bounds = array<i64: 2>, scalar_prefetch = 0 : i64, scratch_operands = 0 : i64, tpu.core_type = #tpu.core_type<tc>, window_params = [{transform_indices = @transform_0, window_bounds = array<i64: 1, 16, 64>}, {pipeline_mode = #tpu.pipeline_mode<synchronous>, transform_indices = @transform_1, window_bounds = array<i64: 3, 64, 128>}, {transform_indices = @transform_2, window_bounds = array<i64: 1, 16, 128>}, {transform_indices = @transform_3, window_bounds = array<i64: 1, 1, 128>}, {transform_indices = @transform_4, window_bounds = array<i64: 1, 1, 128>}]} {
    %c0 = arith.constant 0 : index
    %c0_0 = arith.constant 0 : index
    %c0_1 = arith.constant 0 : index
    %0 = vector.load %arg1[%c0, %c0_0, %c0_1] : memref<1x16x64xf32, #tpu.memory_space<vmem>>, vector<1x16x64xf32>
    %1 = vector.shape_cast %0 : vector<1x16x64xf32> to vector<16x64xf32>
    %c0_2 = arith.constant 0 : index
    %c0_3 = arith.constant 0 : index
    %c0_4 = arith.constant 0 : index
    %2 = vector.load %arg2[%c0_2, %c0_3, %c0_4] : memref<3x64x128xf32, #tpu.memory_space<vmem>>, vector<1x64x128xf32>
    %3 = vector.shape_cast %2 : vector<1x64x128xf32> to vector<64x128xf32>
    %cst = arith.constant dense<0.000000e+00> : vector<16x128xf32>
    %4 = tpu.matmul %1, %3, %cst {dimension_numbers = #tpu.dot_dimension_numbers<[1], [0], [0], [1], [0, 0, 1, 1], [], []>} : vector<16x64xf32>, vector<64x128xf32>, vector<16x128xf32> -> vector<16x128xf32>
    %c1 = arith.constant 1 : index
    %c0_5 = arith.constant 0 : index
    %c0_6 = arith.constant 0 : index
    %5 = vector.load %arg2[%c1, %c0_5, %c0_6] : memref<3x64x128xf32, #tpu.memory_space<vmem>>, vector<1x64x128xf32>
    %6 = vector.shape_cast %5 : vector<1x64x128xf32> to vector<64x128xf32>
    %cst_7 = arith.constant dense<0.000000e+00> : vector<16x128xf32>
    %7 = tpu.matmul %1, %6, %cst_7 {dimension_numbers = #tpu.dot_dimension_numbers<[1], [0], [0], [1], [0, 0, 1, 1], [], []>} : vector<16x64xf32>, vector<64x128xf32>, vector<16x128xf32> -> vector<16x128xf32>
    %c2 = arith.constant 2 : index
    %c0_8 = arith.constant 0 : index
    %c0_9 = arith.constant 0 : index
    %8 = vector.load %arg2[%c2, %c0_8, %c0_9] : memref<3x64x128xf32, #tpu.memory_space<vmem>>, vector<1x64x128xf32>
    %9 = vector.shape_cast %8 : vector<1x64x128xf32> to vector<64x128xf32>
    %cst_10 = arith.constant dense<0.000000e+00> : vector<16x128xf32>
    %10 = tpu.matmul %1, %9, %cst_10 {dimension_numbers = #tpu.dot_dimension_numbers<[1], [0], [0], [1], [0, 0, 1, 1], [], []>} : vector<16x64xf32>, vector<64x128xf32>, vector<16x128xf32> -> vector<16x128xf32>
    %11 = tpu.iota {dimensions = array<i32: 0>} : vector<16x16xi32>
    %12 = tpu.iota {dimensions = array<i32: 1>} : vector<16x16xi32>
    %c1_i32 = arith.constant 1 : i32
    %13 = vector.broadcast %c1_i32 : i32 to vector<16x16xi32>
    %14 = arith.addi %12, %13 : vector<16x16xi32>
    %15 = arith.cmpi eq, %11, %14 : vector<16x16xi32>
    %16 = arith.extui %15 : vector<16x16xi1> to vector<16x16xi32>
    %17 = arith.sitofp %16 : vector<16x16xi32> to vector<16x16xf32>
    %c1_i32_11 = arith.constant 1 : i32
    %18 = vector.broadcast %c1_i32_11 : i32 to vector<16x16xi32>
    %19 = arith.addi %11, %18 : vector<16x16xi32>
    %20 = arith.cmpi eq, %12, %19 : vector<16x16xi32>
    %21 = arith.extui %20 : vector<16x16xi1> to vector<16x16xi32>
    %22 = arith.sitofp %21 : vector<16x16xi32> to vector<16x16xf32>
    %cst_12 = arith.constant dense<0.000000e+00> : vector<16x128xf32>
    %23 = tpu.matmul %17, %4, %cst_12 {dimension_numbers = #tpu.dot_dimension_numbers<[1], [0], [0], [1], [0, 0, 1, 1], [], []>} : vector<16x16xf32>, vector<16x128xf32>, vector<16x128xf32> -> vector<16x128xf32>
    %24 = arith.addf %7, %23 : vector<16x128xf32>
    %cst_13 = arith.constant dense<0.000000e+00> : vector<16x128xf32>
    %25 = tpu.matmul %22, %10, %cst_13 {dimension_numbers = #tpu.dot_dimension_numbers<[1], [0], [0], [1], [0, 0, 1, 1], [], []>} : vector<16x16xf32>, vector<16x128xf32>, vector<16x128xf32> -> vector<16x128xf32>
    %26 = arith.addf %24, %25 : vector<16x128xf32>
    %c0_14 = arith.constant 0 : index
    %c0_15 = arith.constant 0 : index
    %c0_16 = arith.constant 0 : index
    %27 = vector.load %arg3[%c0_14, %c0_15, %c0_16] : memref<1x16x128xf32, #tpu.memory_space<vmem>>, vector<1x16x128xf32>
    %28 = vector.shape_cast %27 : vector<1x16x128xf32> to vector<16x128xf32>
    %29 = vector.shape_cast %26 : vector<16x128xf32> to vector<1x16x128xf32>
    tpu.vector_store %arg3[%c0_14, %c0_15, %c0_16], %29 {strides = array<i32>} : memref<1x16x128xf32, #tpu.memory_space<vmem>>, vector<1x16x128xf32>,
    %cst_17 = arith.constant dense<0.000000e+00> : vector<128xf32>
    %30 = vector.multi_reduction <add>, %26, %cst_17 [0] : vector<16x128xf32> to vector<128xf32>
    %31 = vector.shape_cast %30 : vector<128xf32> to vector<1x128xf32>
    %c0_18 = arith.constant 0 : index
    %c0_19 = arith.constant 0 : index
    %c0_20 = arith.constant 0 : index
    %32 = vector.load %arg4[%c0_18, %c0_19, %c0_20] : memref<1x1x128xf32, #tpu.memory_space<vmem>>, vector<1x1x128xf32>
    %33 = vector.shape_cast %32 : vector<1x1x128xf32> to vector<1x128xf32>
    %34 = vector.shape_cast %31 : vector<1x128xf32> to vector<1x1x128xf32>
    tpu.vector_store %arg4[%c0_18, %c0_19, %c0_20], %34 {strides = array<i32>} : memref<1x1x128xf32, #tpu.memory_space<vmem>>, vector<1x1x128xf32>,
    %35 = arith.mulf %26, %26 : vector<16x128xf32>
    %cst_21 = arith.constant dense<0.000000e+00> : vector<128xf32>
    %36 = vector.multi_reduction <add>, %35, %cst_21 [0] : vector<16x128xf32> to vector<128xf32>
    %37 = vector.shape_cast %36 : vector<128xf32> to vector<1x128xf32>
    %c0_22 = arith.constant 0 : index
    %c0_23 = arith.constant 0 : index
    %c0_24 = arith.constant 0 : index
    %38 = vector.load %arg5[%c0_22, %c0_23, %c0_24] : memref<1x1x128xf32, #tpu.memory_space<vmem>>, vector<1x1x128xf32>
    %39 = vector.shape_cast %38 : vector<1x1x128xf32> to vector<1x128xf32>
    %40 = vector.shape_cast %37 : vector<1x128xf32> to vector<1x1x128xf32>
    tpu.vector_store %arg5[%c0_22, %c0_23, %c0_24], %40 {strides = array<i32>} : memref<1x1x128xf32, #tpu.memory_space<vmem>>, vector<1x1x128xf32>,
    return
  }
  func.func @transform_0(%arg0: i32) -> (i32, i32, i32) {
    %c0_i32 = arith.constant 0 : i32
    %c0_i32_0 = arith.constant 0 : i32
    %c0_i32_1 = arith.constant 0 : i32
    return %arg0, %c0_i32, %c0_i32_0 : i32, i32, i32
  }
  func.func @transform_1(%arg0: i32) -> (i32, i32, i32) {
    %c0_i32 = arith.constant 0 : i32
    %c0_i32_0 = arith.constant 0 : i32
    %c0_i32_1 = arith.constant 0 : i32
    %c0_i32_2 = arith.constant 0 : i32
    return %c0_i32, %c0_i32_0, %c0_i32_1 : i32, i32, i32
  }
  func.func @transform_2(%arg0: i32) -> (i32, i32, i32) {
    %c0_i32 = arith.constant 0 : i32
    %c0_i32_0 = arith.constant 0 : i32
    %c0_i32_1 = arith.constant 0 : i32
    return %arg0, %c0_i32, %c0_i32_0 : i32, i32, i32
  }
  func.func @transform_3(%arg0: i32) -> (i32, i32, i32) {
    %c0_i32 = arith.constant 0 : i32
    %c0_i32_0 = arith.constant 0 : i32
    %c0_i32_1 = arith.constant 0 : i32
    return %arg0, %c0_i32, %c0_i32_0 : i32, i32, i32
  }
  func.func @transform_4(%arg0: i32) -> (i32, i32, i32) {
    %c0_i32 = arith.constant 0 : i32
    %c0_i32_0 = arith.constant 0 : i32
    %c0_i32_1 = arith.constant 0 : i32
    return %arg0, %c0_i32, %c0_i32_0 : i32, i32, i32
  }
}

module attributes {stable_mosaic.version = 11 : i64} {
  func.func @bn_relu_kernel(%arg0: i32, %arg1: memref<1x16x128xf32, #tpu.memory_space<vmem>>, %arg2: memref<1x128xf32, #tpu.memory_space<vmem>>, %arg3: memref<1x128xf32, #tpu.memory_space<vmem>>, %arg4: memref<1x16x128xf32, #tpu.memory_space<vmem>>) attributes {dimension_semantics = [#tpu.dimension_semantics<parallel>], iteration_bounds = array<i64: 2>, scalar_prefetch = 0 : i64, scratch_operands = 0 : i64, tpu.core_type = #tpu.core_type<tc>, window_params = [{transform_indices = @transform_0, window_bounds = array<i64: 1, 16, 128>}, {pipeline_mode = #tpu.pipeline_mode<synchronous>, transform_indices = @transform_1, window_bounds = array<i64: 1, 128>}, {pipeline_mode = #tpu.pipeline_mode<synchronous>, transform_indices = @transform_2, window_bounds = array<i64: 1, 128>}, {transform_indices = @transform_3, window_bounds = array<i64: 1, 16, 128>}]} {
    %c0 = arith.constant 0 : index
    %c0_0 = arith.constant 0 : index
    %c0_1 = arith.constant 0 : index
    %0 = vector.load %arg1[%c0, %c0_0, %c0_1] : memref<1x16x128xf32, #tpu.memory_space<vmem>>, vector<1x16x128xf32>
    %1 = vector.shape_cast %0 : vector<1x16x128xf32> to vector<16x128xf32>
    %c0_2 = arith.constant 0 : index
    %c0_3 = arith.constant 0 : index
    %2 = vector.load %arg2[%c0_2, %c0_3] : memref<1x128xf32, #tpu.memory_space<vmem>>, vector<1x128xf32>
    %3 = vector.broadcast %2 : vector<1x128xf32> to vector<16x128xf32>
    %4 = arith.mulf %1, %3 : vector<16x128xf32>
    %c0_4 = arith.constant 0 : index
    %c0_5 = arith.constant 0 : index
    %5 = vector.load %arg3[%c0_4, %c0_5] : memref<1x128xf32, #tpu.memory_space<vmem>>, vector<1x128xf32>
    %6 = vector.broadcast %5 : vector<1x128xf32> to vector<16x128xf32>
    %7 = arith.addf %4, %6 : vector<16x128xf32>
    %cst = arith.constant 0.000000e+00 : f32
    %8 = vector.broadcast %cst : f32 to vector<16x128xf32>
    %9 = arith.maximumf %7, %8 : vector<16x128xf32>
    %c0_6 = arith.constant 0 : index
    %c0_7 = arith.constant 0 : index
    %c0_8 = arith.constant 0 : index
    %10 = vector.load %arg4[%c0_6, %c0_7, %c0_8] : memref<1x16x128xf32, #tpu.memory_space<vmem>>, vector<1x16x128xf32>
    %11 = vector.shape_cast %10 : vector<1x16x128xf32> to vector<16x128xf32>
    %12 = vector.shape_cast %9 : vector<16x128xf32> to vector<1x16x128xf32>
    tpu.vector_store %arg4[%c0_6, %c0_7, %c0_8], %12 {strides = array<i32>} : memref<1x16x128xf32, #tpu.memory_space<vmem>>, vector<1x16x128xf32>,
    return
  }
  func.func @transform_0(%arg0: i32) -> (i32, i32, i32) {
    %c0_i32 = arith.constant 0 : i32
    %c0_i32_0 = arith.constant 0 : i32
    %c0_i32_1 = arith.constant 0 : i32
    return %arg0, %c0_i32, %c0_i32_0 : i32, i32, i32
  }
  func.func @transform_1(%arg0: i32) -> (i32, i32) {
    %c0_i32 = arith.constant 0 : i32
    %c0_i32_0 = arith.constant 0 : i32
    %c0_i32_1 = arith.constant 0 : i32
    return %c0_i32, %c0_i32_0 : i32, i32
  }
  func.func @transform_2(%arg0: i32) -> (i32, i32) {
    %c0_i32 = arith.constant 0 : i32
    %c0_i32_0 = arith.constant 0 : i32
    %c0_i32_1 = arith.constant 0 : i32
    return %c0_i32, %c0_i32_0 : i32, i32
  }
  func.func @transform_3(%arg0: i32) -> (i32, i32, i32) {
    %c0_i32 = arith.constant 0 : i32
    %c0_i32_0 = arith.constant 0 : i32
    %c0_i32_1 = arith.constant 0 : i32
    return %arg0, %c0_i32, %c0_i32_0 : i32, i32, i32
  }
}

</mosaic_0001>

<bundles_post_ra>
// kernel: tile.13
= control target key start
LH: loop header
LB: loop body
LE: loop exit
PB: predicated region body
PF: predicated region fallthrough
CT: control target
= control target key end

     0   :  { %s28_s0 = inlined_call_operand.vmem [shape: f32[8], index: 0, kind: input, shape index: {}]   ;;  %s29_s1 = inlined_call_operand.vmem [shape: f32[16,8], index: 1, kind: output, shape index: {}]  }
   0x1   :  { %v4_v0 = vld [vmem:[%s28_s0] ss:$0 sm:$0xff] }
   0x2   :  { %5 = vst [vmem:[%s29_s1] sm:$0xff] %v4_v0 }
   0x3   :  { %8 = vst [vmem:[%s29_s1 + $0x8] sm:$0xff] %v4_v0 }

// kernel: tile.14
= control target key start
LH: loop header
LB: loop body
LE: loop exit
PB: predicated region body
PF: predicated region fallthrough
CT: control target
= control target key end

     0   :  { %s131_s10 = smov 120   ;;  %s132_s11 = smov 104   ;;  %vm3_vm0 = vcmask 64512   ;;  %vm9_vm1 = vcmask 1048512   ;;  %vm15_vm2 = vcmask 982912   ;;  %vm21_vm3 = vcmask 917312   ;;  %s207_s0 = inlined_call_operand.vmem [shape: f32[16,8], index: 0, kind: input, shape index: {}]   ;;  %s208_s1 = inlined_call_operand.vmem [shape: f32[1,128], index: 1, kind: output, shape index: {}]  }
   0x1   :  { %v101_v0 = vld [vmem:[%s207_s0 + $0xf] sm:$0x1]   ;;  %v103_v1 = vld [vmem:[%s207_s0 + $0xd] sm:$0x1]   ;;  %v105_v2 = vld [vmem:[%s207_s0 + $0xb] sm:$0x1]  }
   0x2   :  { %7 = vrot.lane.b32.xlu0 %v101_v0, %s131_s10  ;;  %19 = vrot.lane.b32.xlu1 %v103_v1, %s132_s11  ;;  %s133_s14 = smov 88   ;;  %v102_v3 = vld [vmem:[%s207_s0 + $0xe] sm:$0x1]   ;;  %v104_v4 = vld [vmem:[%s207_s0 + $0xc] sm:$0x1]   ;;  %s134_s19 = smov 112  }
   0x3   :  { %31 = vrot.lane.b32.xlu2 %v105_v2, %s133_s14  ;;  %s135_s20 = smov 96   ;;  %v106_v5 = vld [vmem:[%s207_s0 + $0xa] sm:$0x1]   ;;  %s136_s23 = smov 80   ;;  %v107_v6 = vld [vmem:[%s207_s0 + $0x9] sm:$0x1]  }
   0x4   :  { %v108_v7 = vld [vmem:[%s207_s0 + $0x8] sm:$0x1]   ;;  %s137_s28 = smov 72   ;;  %s138_s29 = smov 64   ;;  %v109_v8 = vld [vmem:[%s207_s0 + $0x7] sm:$0x1]  }
   0x5   :  { %s139_s3 = smov 56   ;;  %v110_v9 = vld [vmem:[%s207_s0 + $0x6] sm:$0x1]   ;;  %v111_v10 = vld [vmem:[%s207_s0 + $0x5] sm:$0x1]   ;;  %s140_s8 = smov 48  }
   0x6   :  { %s141_s9 = smov 40   ;;  %v112_v11 = vld [vmem:[%s207_s0 + $0x4] sm:$0x1]   ;;  %s142_s12 = smov 32   ;;  %v113_v12 = vld [vmem:[%s207_s0 + $0x3] sm:$0x1]  }
   0x7   :  { %v114_v13 = vld [vmem:[%s207_s0 + $0x2] sm:$0x1]   ;;  %s143_s17 = smov 24   ;;  %s144_s18 = smov 16   ;;  %v115_v14 = vld [vmem:[%s207_s0 + $0x1] sm:$0x1]  }
   0x8   :  { %s145_s21 = smov 8   ;;  %v2_v15 = vld [vmem:[%s207_s0] sm:$0x1]   ;;  %vm27_vm4 = vcmask 851712   ;;  %vm33_vm5 = vcmask 786112   ;;  %vm39_vm6 = vcmask 720512  }
   0x9   :  { %4 = vst.msk [vmem:[#allocation0] sm:$0x1] %vm3_vm0, %v2_v15   ;;  %vm45_vm7 = vcmask 654912   ;;  %vm51_vm8 = vcmask 589312   ;;  %vm57_vm9 = vcmask 523712   ;;  %vm63_vm10 = vcmask 458112  }
   0xa   :  { %13 = vrot.lane.b32.xlu0 %v102_v3, %s134_s19  ;;  %25 = vrot.lane.b32.xlu1 %v104_v4, %s135_s20  ;;  %vm69_vm11 = vcmask 392512   ;;  %vm75_vm12 = vcmask 326912   ;;  %vm81_vm13 = vcmask 261312   ;;  %vm87_vm14 = vcmask 195712  }
   0xb   :  { %37 = vrot.lane.b32.xlu2 %v106_v5, %s136_s23  ;;  %vm93_vm15 = vcmask 130112  }
  0x12   :  { %43 = vrot.lane.b32.xlu0 %v107_v6, %s137_s28  ;;  %49 = vrot.lane.b32.xlu1 %v108_v7, %s138_s29 }
  0x13   :  { %55 = vrot.lane.b32.xlu2 %v109_v8, %s139_s3 }
  0x1a   :  { %61 = vrot.lane.b32.xlu0 %v110_v9, %s140_s8  ;;  %67 = vrot.lane.b32.xlu1 %v111_v10, %s141_s9 }
  0x1b   :  { %73 = vrot.lane.b32.xlu2 %v112_v11, %s142_s12 }
  0x22   :  { %79 = vrot.lane.b32.xlu0 %v113_v12, %s143_s17  ;;  %85 = vrot.lane.b32.xlu1 %v114_v13, %s144_s18 }
  0x23   :  { %91 = vrot.lane.b32.xlu2 %v115_v14, %s145_s21 }
  0x5d   :  { %v32_v16 = vpop.permute.xlu2 %31  }
  0x65   :  { %v38_v17 = vpop.permute.xlu2 %37  }
  0x6d   :  { %v56_v18 = vpop.permute.xlu2 %55  }
  0x74   :  { %v8_v19 = vpop.permute.xlu0 %7   ;;  %v20_v20 = vpop.permute.xlu1 %19  }
  0x75   :  { %10 = vst.msk [vmem:[#allocation0] sm:$0x1] %vm9_vm1, %v8_v19   ;;  %v74_v21 = vpop.permute.xlu2 %73  }
  0x7c   :  { %v14_v22 = vpop.permute.xlu0 %13   ;;  %v26_v23 = vpop.permute.xlu1 %25  }
  0x7d   :  { %16 = vst.msk [vmem:[#allocation0] sm:$0x1] %vm15_vm2, %v14_v22   ;;  %v92_v24 = vpop.permute.xlu2 %91  }
  0x7e   :  { %22 = vst.msk [vmem:[#allocation0] sm:$0x1] %vm21_vm3, %v20_v20  }
  0x7f   :  { %28 = vst.msk [vmem:[#allocation0] sm:$0x1] %vm27_vm4, %v26_v23  }
  0x80   :  { %34 = vst.msk [vmem:[#allocation0] sm:$0x1] %vm33_vm5, %v32_v16  }
  0x81   :  { %40 = vst.msk [vmem:[#allocation0] sm:$0x1] %vm39_vm6, %v38_v17  }
  0x84   :  { %v44_v25 = vpop.permute.xlu0 %43   ;;  %v50_v26 = vpop.permute.xlu1 %49  }
  0x85   :  { %46 = vst.msk [vmem:[#allocation0] sm:$0x1] %vm45_vm7, %v44_v25  }
  0x86   :  { %52 = vst.msk [vmem:[#allocation0] sm:$0x1] %vm51_vm8, %v50_v26  }
  0x87   :  { %58 = vst.msk [vmem:[#allocation0] sm:$0x1] %vm57_vm9, %v56_v18  }
  0x8c   :  { %v62_v27 = vpop.permute.xlu0 %61   ;;  %v68_v28 = vpop.permute.xlu1 %67  }
  0x8d   :  { %64 = vst.msk [vmem:[#allocation0] sm:$0x1] %vm63_vm10, %v62_v27  }
  0x8e   :  { %70 = vst.msk [vmem:[#allocation0] sm:$0x1] %vm69_vm11, %v68_v28  }
  0x8f   :  { %76 = vst.msk [vmem:[#allocation0] sm:$0x1] %vm75_vm12, %v74_v21  }
  0x94   :  { %v80_v29 = vpop.permute.xlu0 %79   ;;  %v86_v30 = vpop.permute.xlu1 %85  }
  0x95   :  { %82 = vst.msk [vmem:[#allocation0] sm:$0x1] %vm81_vm13, %v80_v29  }
  0x96   :  { %88 = vst.msk [vmem:[#allocation0] sm:$0x1] %vm87_vm14, %v86_v30  }
  0x97   :  { %94 = vst.msk [vmem:[#allocation0] sm:$0x1] %vm93_vm15, %v92_v24  }
  0x9e   :  { %v97_v31 = vld [vmem:[#allocation0] sm:$0x1] }
  0x9f   :  { %100 = vst [vmem:[%s208_s1] sm:$0x1] %v97_v31 }

// kernel: conv_block_forward.2
= control target key start
LH: loop header
LB: loop body
LE: loop exit
PB: predicated region body
PF: predicated region fallthrough
CT: control target
= control target key end

     0   :  { %s611_s15 = smov 0   ;;  %s725_s0 = inlined_call_operand.vmem [shape: f32[2,16,64], index: 0, kind: input, shape index: {}]   ;;  %s726_s1 = inlined_call_operand.vmem [shape: f32[3,64,128], index: 1, kind: input, shape index: {}]   ;;  %s727_s2 = inlined_call_operand.vmem [shape: f32[2,16,128], index: 2, kind: output, shape index: {0}]   ;;  %s728_s3 = inlined_call_operand.vmem [shape: f32[2,1,128], index: 3, kind: output, shape index: {1}]   ;;  %s729_s4 = inlined_call_operand.vmem [shape: f32[2,1,128], index: 4, kind: output, shape index: {2}]  }
   0x1 LB: > { %s525_s16 = sadd.s32 4294967295, %s583_s15   ;;  %p529_p0 = scmp.ge.s32.totalorder %s583_s15, 1  ;;  %s583_s15 = sphi %s611_s15, %s15_s15  }
   0x2   : > { %p167_p1 = scmp.lt.s32.totalorder %s583_s15, 3 }
   0x4   : > { %p168_p2 = pnand %p529_p0, %p167_p1 }
   0x5   : > { %p199_p3 = scmp.lt.s32.totalorder (!%p168_p2), %s525_s16, 1 }
   0x6   : > { %171 = sbr.rel (%p168_p2) target bundleno = 339 (0x153), region = 28 }
   0xb   : > { %v224_v0 = vld [vmem:[%s726_s1 + $0x38] sm:$0xff]  ;;  %v223_v1 = vld [vmem:[%s726_s1 + $0x30] sm:$0xff]  ;;  %v222_v4 = vld [vmem:[%s726_s1 + $0x28] sm:$0xff]  ;;  %s731_s16 = smov (!%p199_p3, %s525_s16), 1  ;;  %vm225_vm0 = vcmask 523264   ;;  %v296_v26 = vlaneseq  ;;  %v585_v33 = vmov 0.0  }
   0xc   : > { %v551_v2 = vld [vmem:[%s726_s1 + $0xb8] sm:$0xff]  ;;  %240 = vmatpush.msra.mxu0 %v224_v0  ;;  %v550_v3 = vld [vmem:[%s726_s1 + $0xb0] sm:$0xff]  ;;  %v549_v5 = vld [vmem:[%s726_s1 + $0xa8] sm:$0xff]  ;;  %s566_s17 = sshll.u32 %s731_s16, 4  ;;  %vm316_vm2 = vcmask 130048   ;;  %s214_s29 = scalar_lea.vmem %s729_s4, %s731_s16 }
   0xd   : > { %281 = vmatpush.msra.mxu1 %v551_v2  ;;  %v221_v6 = vld [vmem:[%s726_s1 + $0x20] sm:$0xff]  ;;  %v543_v8 = vld [vmem:[%s726_s1 + $0x78] sm:$0xff]  ;;  %v542_v9 = vld [vmem:[%s726_s1 + $0x70] sm:$0xff]  ;;  %s203_s26 = scalar_lea.vmem %s725_s0, %s566_s17  ;;  %v300_v27 = vand.u32 127, %v296_v26  ;;  %v297_v30 = vshrl.u32 %v296_v26, 7  ;;  %s208_s24 = scalar_lea.vmem %s727_s2, %s566_s17 }
   0xe   : > { %241 = vmatpush.msra.mxu0 %v223_v1  ;;  %v548_v7 = vld [vmem:[%s726_s1 + $0xa0] sm:$0xff]  ;;  %v220_v10 = vld [vmem:[%s726_s1 + $0x18] sm:$0xff]  ;;  %354 = vmatpush.msra.mxu3 %v543_v8  ;;  %v219_v12 = vld [vmem:[%s726_s1 + $0x10] sm:$0xff] }
   0xf   : > { %282 = vmatpush.msra.mxu1 %v550_v3  ;;  %v547_v11 = vld [vmem:[%s726_s1 + $0x98] sm:$0xff]  ;;  %v546_v13 = vld [vmem:[%s726_s1 + $0x90] sm:$0xff]  ;;  %v218_v14 = vld [vmem:[%s726_s1 + $0x8] sm:$0xff]  ;;  %v301_v31 = vadd.s32 1, %v300_v27  ;;  %v298_v36 = vadd.s32 8, %v297_v30  ;;  %v308_v38 = vadd.s32 1, %v297_v30 }
  0x10   : > { %242 = vmatpush.msra.mxu0 %v222_v4  ;;  %355 = vmatpush.msra.mxu3 %v542_v9  ;;  %v545_v15 = vld [vmem:[%s726_s1 + $0x88] sm:$0xff]  ;;  %v217_v16 = vld [vmem:[%s726_s1] sm:$0xff]  ;;  %v539_v22 = vld [vmem:[%s726_s1 + $0x58] sm:$0xff] }
  0x11   : > { %283 = vmatpush.msra.mxu1 %v549_v5  ;;  %v544_v17 = vld [vmem:[%s726_s1 + $0x80] sm:$0xff]  ;;  %v216_v19 = vld [vmem:[%s203_s26 + $0x8] sm:$0xff]  ;;  %v538_v23 = vld [vmem:[%s726_s1 + $0x50] sm:$0xff]  ;;  %vm302_vm1 = vcmp.eq.s32.totalorder %v297_v30, %v301_v31  ;;  %vm303_vm3 = vcmp.eq.s32.totalorder %v298_v36, %v301_v31  ;;  %vm310_vm4 = vcmp.eq.s32.totalorder %v300_v27, %v308_v38  ;;  %v309_v40 = vadd.s32 1, %v298_v36 }
  0x12   : > { %243 = vmatpush.msra.mxu0 %v221_v6  ;;  %v215_v18 = vld [vmem:[%s203_s26] sm:$0xff]  ;;  %v541_v20 = vld [vmem:[%s726_s1 + $0x68] sm:$0xff]  ;;  %v554_v34 = vsel %vm302_vm1, 1.0, %v585_v33  ;;  %v555_v37 = vsel %vm303_vm3, 1.0, %v585_v33  ;;  %v556_v39 = vsel %vm310_vm4, 1.0, %v585_v33  ;;  %s211_s26 = scalar_lea.vmem %s728_s3, %s731_s16 }
  0x13   : > { %284 = vmatpush.msra.mxu1 %v548_v7  ;;  %v540_v21 = vld [vmem:[%s726_s1 + $0x60] sm:$0xff]  ;;  %356 = vmatpush.msra.mxu3 %v541_v20  ;;  %v537_v24 = vld [vmem:[%s726_s1 + $0x48] sm:$0xff]  ;;  %vm311_vm5 = vcmp.eq.s32.totalorder %v300_v27, %v309_v40 }
  0x14   : > { %244 = vmatpush.msra.mxu0 %v220_v10  ;;  %v536_v25 = vld [vmem:[%s726_s1 + $0x40] sm:$0xff]  ;;  %v557_v41 = vsel %vm311_vm5, 1.0, %v585_v33 }
  0x15   : > { %285 = vmatpush.msra.mxu1 %v547_v11  ;;  %357 = vmatpush.msra.mxu3 %v540_v21 }
  0x16   : > { %245 = vmatpush.msra.mxu0 %v219_v12 }
  0x17   : > { %286 = vmatpush.msra.mxu1 %v546_v13  ;;  %358 = vmatpush.msra.mxu3 %v539_v22 }
  0x18   : > { %246 = vmatpush.msra.mxu0 %v218_v14 }
  0x19   : > { %287 = vmatpush.msra.mxu1 %v545_v15  ;;  %359 = vmatpush.msra.mxu3 %v538_v23 }
  0x1a   : > { %247 = vmatpush.msra.mxu0 %v217_v16 }
  0x1b   : > { %288 = vmatpush.msra.mxu1 %v544_v17  ;;  %534 = vmatmul.msk.f32.vlgmr.msra.gmra.mxu0 %vm225_vm0, %v215_v18 }
  0x1c   : > { %552 = vmatmul.msk.f32.vlgmr.msra.gmra.mxu1 %vm225_vm0, %v215_v18  ;;  %360 = vmatpush.msra.mxu3 %v537_v24 }
  0x1e   : > { %361 = vmatpush.msra.mxu3 %v536_v25 }
  0x1f   : > { %560 = vmatmul.msk.f32.vlgmr.msra.gmra.mxu3 %vm225_vm0, %v215_v18 }
  0x23   : > { %535 = vmatmul.msk.f32.gmra.mxu0 %vm225_vm0, %v216_v19 }
  0x24   : > { %553 = vmatmul.msk.f32.gmra.mxu1 %vm225_vm0, %v216_v19 }
  0x27   : > { %561 = vmatmul.msk.f32.gmra.mxu3 %vm225_vm0, %v216_v19 }
  0x98   : > { %v249_v28 = vpop.f32.mrf.mxu0 }
  0x99   : > { %v290_v29 = vpop.f32.mrf.mxu1 }
  0xa0   : > { %v252_v32 = vpop.f32.mrf.mxu0 }
  0xa1   : > { %337 = vmatpush.msra.mxu2 %v252_v32  ;;  %v293_v35 = vpop.f32.mrf.mxu1 }
  0xa2   : > { %v363_v44 = vpop.f32.mrf.mxu3 }
  0xa3   : > { %338 = vmatpush.msra.mxu2 %v249_v28 }
  0xa4   : > { %558 = vmatmul.msk.f32.vlgmr.msra.gmra.mxu2 %vm316_vm2, %v554_v34 }
  0xa5   : > { %389 = vmatpush.msrb.mxu2 %v293_v35 }
  0xa7   : > { %390 = vmatpush.msrb.mxu2 %v290_v29 }
  0xaa   : > { %v366_v48 = vpop.f32.mrf.mxu3 }
  0xac   : > { %559 = vmatmul.msk.f32.gmra.mxu2 %vm316_vm2, %v555_v37 }
  0xb4   : > { %562 = vmatmul.msk.f32.vlgmr.msrb.gmra.mxu2 %vm316_vm2, %v556_v39 }
  0xbc   : > { %563 = vmatmul.msk.f32.gmra.mxu2 %vm316_vm2, %v557_v41 }
 0x127   : > { %v340_v42 = vpop.f32.mrf.mxu2 }
 0x128   : > { %v364_v45 = vadd.f32 %v363_v44, %v340_v42 }
 0x12f   : > { %v343_v43 = vpop.f32.mrf.mxu2 }
 0x130   : > { %v367_v49 = vadd.f32 %v366_v48, %v343_v43 }
 0x137   : > { %v392_v46 = vpop.f32.mrf.mxu2 }
 0x138   : > { %v398_v47 = vadd.f32 %v392_v46, %v364_v45 }
 0x13a   : > { %400 = vst [vmem:[%s208_s24] sm:$0xff] %v398_v47  ;;  %v410_v52 = vmul.f32 %v398_v47, %v398_v47 }
 0x13f   : > { %v395_v50 = vpop.f32.mrf.mxu2 }
 0x140   : > { %v399_v51 = vadd.f32 %v395_v50, %v367_v49 }
 0x142   : > { %401 = vst [vmem:[%s208_s24 + $0x8] sm:$0xff] %v399_v51  ;;  %v402_v53 = vadd.f32 %v399_v51, %v398_v47  ;;  %v411_v54 = vmul.f32 %v399_v51, %v399_v51 }
 0x144   : > { %v403_v55 = vrot.slane %v402_v53, 4  ;;  %v412_v56 = vadd.f32 %v411_v54, %v410_v52 }
 0x146   : > { %v404_v57 = vadd.f32 %v403_v55, %v402_v53  ;;  %v413_v58 = vrot.slane %v412_v56, 4 }
 0x148   : > { %v405_v59 = vrot.slane %v404_v57, 2  ;;  %v414_v60 = vadd.f32 %v413_v58, %v412_v56 }
 0x14a   : > { %v406_v61 = vadd.f32 %v405_v59, %v404_v57  ;;  %v415_v62 = vrot.slane %v414_v60, 2 }
 0x14c   : > { %v407_v63 = vrot.slane %v406_v61, 1  ;;  %v416_v0 = vadd.f32 %v415_v62, %v414_v60 }
 0x14e   : > { %v408_v1 = vadd.f32 %v407_v63, %v406_v61  ;;  %v417_v2 = vrot.slane %v416_v0, 1 }
 0x150   : > { %409 = vst [vmem:[%s211_s26] sm:$0x1] %v408_v1  ;;  %v418_v3 = vadd.f32 %v417_v2, %v416_v0 }
 0x152   : > { %419 = vst [vmem:[%s214_s29] sm:$0x1] %v418_v3 }
 0x153 PF: > { %s15_s15 = sadd.s32 1, %s583_s15  }
 0x154   : > { %p12_p4 = scmp.ge.s32.totalorder %s15_s15, 4  }
 0x156   :  { %14 = sbr.rel (!%p12_p4) target bundleno = 1 (0x1), region = 84 }

// kernel: conv_block_forward.3
= control target key start
LH: loop header
LB: loop body
LE: loop exit
PB: predicated region body
PF: predicated region fallthrough
CT: control target
= control target key end

     0   :  { %s295_s12 = smov 0   ;;  %s312_s0 = inlined_call_operand.vmem [shape: f32[2,16,128], index: 0, kind: input, shape index: {}]   ;;  %s313_s1 = inlined_call_operand.vmem [shape: f32[1,128], index: 1, kind: input, shape index: {}]   ;;  %s314_s2 = inlined_call_operand.vmem [shape: f32[1,128], index: 2, kind: input, shape index: {}]   ;;  %s315_s3 = inlined_call_operand.vmem [shape: f32[2,16,128], index: 3, kind: output, shape index: {}]  }
   0x1 LB: > { %s244_s13 = sadd.s32 4294967295, %s273_s12   ;;  %p248_p0 = scmp.ge.s32.totalorder %s273_s12, 1  ;;  %s273_s12 = sphi %s295_s12, %s13_s12  }
   0x2   : > { %p137_p1 = scmp.lt.s32.totalorder %s273_s12, 3 }
   0x4   : > { %p138_p2 = pnand %p248_p0, %p137_p1 }
   0x5   : > { %p161_p3 = scmp.lt.s32.totalorder (!%p138_p2), %s244_s13, 1 }
   0x6   : > { %141 = sbr.rel (%p138_p2) target bundleno = 23 (0x17), region = 32 }
   0xb   : > { %s317_s13 = smov (!%p161_p3, %s244_s13), 1  ;;  %v265_v0 = vld [vmem:[%s313_s1] ss:$0 sm:$0xff] }
   0xc   : > { %s255_s16 = sshll.u32 %s317_s13, 4  ;;  %v266_v1 = vld [vmem:[%s314_s2] ss:$0 sm:$0xff] }
   0xd   : > { %s165_s19 = scalar_lea.vmem %s312_s0, %s255_s16  ;;  %s170_s24 = scalar_lea.vmem %s315_s3, %s255_s16 }
   0xe   : > { %v171_v2 = vld [vmem:[%s165_s19] sm:$0xff]  ;;  %v172_v3 = vld [vmem:[%s165_s19 + $0x8] sm:$0xff] }
   0xf   : > { %v177_v4 = vmul.f32 %v265_v0, %v171_v2  ;;  %v178_v5 = vmul.f32 %v265_v0, %v172_v3 }
  0x11   : > { %v183_v6 = vadd.f32 %v266_v1, %v177_v4  ;;  %v184_v7 = vadd.f32 %v266_v1, %v178_v5 }
  0x13   : > { %v185_v8 = vmax.f32 %v183_v6, 0.0  ;;  %v186_v9 = vmax.f32 %v184_v7, 0.0 }
  0x15   : > { %187 = vst [vmem:[%s170_s24] sm:$0xff] %v185_v8 }
  0x16   : > { %188 = vst [vmem:[%s170_s24 + $0x8] sm:$0xff] %v186_v9 }
  0x17 PF: > { %s13_s12 = sadd.s32 1, %s273_s12  }
  0x18   : > { %p10_p4 = scmp.ge.s32.totalorder %s13_s12, 4  }
  0x1a   :  { %12 = sbr.rel (!%p10_p4) target bundleno = 1 (0x1), region = 62 }

</bundles_post_ra>
